<compile_context>
chip_gen: v6e
topology: v6e:2x2x1
jax: 0.10.0
libtpu: 0.0.40
codegen_flags: <defaults>
</compile_context>

<pallas_src>
import jax
import jax.numpy as jnp
from jax.experimental import pallas as pl
from jax.experimental.pallas import tpu as pltpu

_LANES = 128          # padded output width (one full lane group)
_NEG_BIAS = -1e30     # finite large-negative bias for padded logit columns


def policy_kernel(x_ref, w1_ref, b1_ref, w2_ref, b2_ref, out_ref):
    # Linear 1 + ReLU (MXU matmul, f32 accumulate)
    x = x_ref[...]
    h = jnp.dot(x, w1_ref[...], preferred_element_type=jnp.float32) + b1_ref[...]
    h = jnp.maximum(h, 0.0)

    # Linear 2 over the padded (H, 128) weight; padded columns get bias -1e30.
    logits = jnp.dot(h, w2_ref[...], preferred_element_type=jnp.float32) + b2_ref[...]

    # LogSoftmax(dim=-1), numerically stable; exp computed ONCE and reused.
    # Padded columns: shifted ~ -1e30 -> exp underflows to 0, so they do not
    # perturb the softmax over the real columns.
    m = jnp.max(logits, axis=-1, keepdims=True)
    shifted = logits - m
    p = jnp.exp(shifted)
    s = jnp.sum(p, axis=-1, keepdims=True)
    logp = shifted - jnp.log(s)
    probs = p / s                     # exact divide: sum(probs) == 1 to 1e-5

    # Packed lane-dense output: [ logp (128 lanes) | probs (128 lanes) ].
    # Both stores are full-width, unmasked, lane-aligned.
    out_ref[:, :_LANES] = logp.astype(out_ref.dtype)
    out_ref[:, _LANES:] = probs.astype(out_ref.dtype)


def _pad_params(w2, b2):
    """Pad last Linear to 128 output lanes; padded columns get a -1e30 bias."""
    H, A = w2.shape
    w2p = jnp.zeros((H, _LANES), w2.dtype).at[:, :A].set(w2)
    b2p = jnp.full((1, _LANES), _NEG_BIAS, b2.dtype).at[:, :A].set(b2.reshape(1, A))
    return w2p, b2p


def _forward_single_shot(state, w1, b1, w2p, b2p):
    """No grid, no pipelining: whole (tiny) problem lives in VMEM for one call."""
    B = state.shape[0]
    vmem = pl.BlockSpec(memory_space=pltpu.MemorySpace.VMEM)
    return pl.pallas_call(
        policy_kernel,
        out_shape=jax.ShapeDtypeStruct((B, 2 * _LANES), jnp.float32),
        in_specs=[vmem, vmem, vmem, vmem, vmem],
        out_specs=vmem,
    )(state, w1, b1, w2p, b2p)


def _forward_batched(state_padded, w1, b1, w2p, b2p, tb):
    """Batch-tiled path: weights/biases resident, batch axis parallel (megacore)."""
    Bp, D = state_padded.shape
    H = w1.shape[1]
    grid = (Bp // tb,)
    return pl.pallas_call(
        policy_kernel,
        out_shape=jax.ShapeDtypeStruct((Bp, 2 * _LANES), jnp.float32),
        grid=grid,
        in_specs=[
            pl.BlockSpec((tb, D), lambda i: (i, 0)),        # activations stream per tile
            pl.BlockSpec((D, H), lambda i: (0, 0)),         # W1 resident across tiles
            pl.BlockSpec((1, H), lambda i: (0, 0)),         # b1 resident
            pl.BlockSpec((H, _LANES), lambda i: (0, 0)),    # W2 (padded) resident
            pl.BlockSpec((1, _LANES), lambda i: (0, 0)),    # b2 (padded) resident
        ],
        out_specs=pl.BlockSpec((tb, 2 * _LANES), lambda i: (i, 0)),
        compiler_params=pltpu.CompilerParams(
            dimension_semantics=("parallel",),              # v7x megacore: split tiles
        ),
    )(state_padded, w1, b1, w2p, b2p)


def policy_network_forward(state, w1, b1, w2, b2, batch_tile=2048):
    """state: (B, num_inputs); returns (log_probs, probs), each (B, num_actions)."""
    B, _ = state.shape
    A = w2.shape[1]
    w2p, b2p = _pad_params(w2, b2)

    if B >= batch_tile:
        # cdiv grid with a zero-padded last tile (no single-shot fallback for
        # ragged large batches -> pipeline + both v7x TensorCores stay engaged).
        Bp = batch_tile * pl.cdiv(B, batch_tile)
        state_p = state if Bp == B else jnp.pad(state, ((0, Bp - B), (0, 0)))
        out = _forward_batched(state_p, w1, b1, w2p, b2p, batch_tile)[:B]
    else:
        out = _forward_single_shot(state, w1, b1, w2p, b2p)

    log_probs = out[:, :A]
    probs = out[:, _LANES:_LANES + A]
    return log_probs, probs


def init_params(key, num_inputs, num_actions, hidden_size):
    """Deterministic PyTorch-Linear-style init: U(-1/sqrt(fan_in), 1/sqrt(fan_in))."""
    k1, k2, k3, k4 = jax.random.split(key, 4)
    lim1 = 1.0 / jnp.sqrt(jnp.float32(num_inputs))
    lim2 = 1.0 / jnp.sqrt(jnp.float32(hidden_size))
    w1 = jax.random.uniform(k1, (num_inputs, hidden_size), jnp.float32, -lim1, lim1)
    b1 = jax.random.uniform(k2, (1, hidden_size), jnp.float32, -lim1, lim1)
    w2 = jax.random.uniform(k3, (hidden_size, num_actions), jnp.float32, -lim2, lim2)
    b2 = jax.random.uniform(k4, (1, num_actions), jnp.float32, -lim2, lim2)
    return w1, b1, w2, b2


def _reference(state, w1, b1, w2, b2):
    h = jnp.maximum(state @ w1 + b1, 0.0)
    logits = h @ w2 + b2
    logp = jax.nn.log_softmax(logits, axis=-1)
    return logp, jnp.exp(logp)


if __name__ == "__main__":
    NN_size = 64
    num_inputs = 16
    num_actions = 8

    key = jax.random.PRNGKey(0)
    kx, kp, kx2 = jax.random.split(key, 3)
    w1, b1, w2, b2 = init_params(kp, num_inputs, num_actions, NN_size)

    # --- Small single-shot path (matches the original toy usage) ---
    batch = 8
    state = jax.random.normal(kx, (batch, num_inputs), jnp.float32)
    log_probs, probs = policy_network_forward(state, w1, b1, w2, b2)
    jax.block_until_ready((log_probs, probs))

    logp_ref, probs_ref = _reference(state, w1, b1, w2, b2)
    assert log_probs.shape == (batch, num_actions)
    assert probs.shape == (batch, num_actions)
    assert jnp.allclose(log_probs, logp_ref, atol=1e-5, rtol=1e-5)
    assert jnp.allclose(probs, probs_ref, atol=1e-5, rtol=1e-5)
    assert jnp.allclose(jnp.sum(probs, axis=-1), 1.0, atol=1e-5)

    # --- Batched (grid) path with a non-divisible batch: cdiv grid + padded tail ---
    big_batch = 600                      # not a multiple of the tile -> exercises padding
    tile = 256                           # small tile to keep the demo tiny (prod default: 2048)
    state_big = jax.random.normal(kx2, (big_batch, num_inputs), jnp.float32)
    log_probs_b, probs_b = policy_network_forward(state_big, w1, b1, w2, b2, batch_tile=tile)
    jax.block_until_ready((log_probs_b, probs_b))

    logp_ref_b, probs_ref_b = _reference(state_big, w1, b1, w2, b2)
    assert log_probs_b.shape == (big_batch, num_actions)
    assert jnp.allclose(log_probs_b, logp_ref_b, atol=1e-5, rtol=1e-5)
    assert jnp.allclose(probs_b, probs_ref_b, atol=1e-5, rtol=1e-5)
    assert jnp.allclose(jnp.sum(probs_b, axis=-1), 1.0, atol=1e-5)

    print("KERNEL_OK")
</pallas_src>

<mosaic_0001>
module attributes {stable_mosaic.version = 11 : i64} {
  func.func @policy_kernel(%arg0: memref<8x16xf32, #tpu.memory_space<vmem>>, %arg1: memref<16x64xf32, #tpu.memory_space<vmem>>, %arg2: memref<1x64xf32, #tpu.memory_space<vmem>>, %arg3: memref<64x128xf32, #tpu.memory_space<vmem>>, %arg4: memref<1x128xf32, #tpu.memory_space<vmem>>, %arg5: memref<8x256xf32, #tpu.memory_space<vmem>>) attributes {dimension_semantics = [], scalar_prefetch = 0 : i64, scratch_operands = 0 : i64, tpu.core_type = #tpu.core_type<tc>} {
    %c0 = arith.constant 0 : index
    %c0_0 = arith.constant 0 : index
    %0 = vector.load %arg0[%c0, %c0_0] : memref<8x16xf32, #tpu.memory_space<vmem>>, vector<8x16xf32>
    %c0_1 = arith.constant 0 : index
    %c0_2 = arith.constant 0 : index
    %1 = vector.load %arg1[%c0_1, %c0_2] : memref<16x64xf32, #tpu.memory_space<vmem>>, vector<16x64xf32>
    %cst = arith.constant dense<0.000000e+00> : vector<8x64xf32>
    %2 = tpu.matmul %0, %1, %cst {dimension_numbers = #tpu.dot_dimension_numbers<[1], [0], [0], [1], [0, 0, 1, 1], [], []>} : vector<8x16xf32>, vector<16x64xf32>, vector<8x64xf32> -> vector<8x64xf32>
    %c0_3 = arith.constant 0 : index
    %c0_4 = arith.constant 0 : index
    %3 = vector.load %arg2[%c0_3, %c0_4] : memref<1x64xf32, #tpu.memory_space<vmem>>, vector<1x64xf32>
    %4 = vector.broadcast %3 : vector<1x64xf32> to vector<8x64xf32>
    %5 = arith.addf %2, %4 : vector<8x64xf32>
    %cst_5 = arith.constant 0.000000e+00 : f32
    %6 = vector.broadcast %cst_5 : f32 to vector<8x64xf32>
    %7 = arith.maximumf %5, %6 : vector<8x64xf32>
    %c0_6 = arith.constant 0 : index
    %c0_7 = arith.constant 0 : index
    %8 = vector.load %arg3[%c0_6, %c0_7] : memref<64x128xf32, #tpu.memory_space<vmem>>, vector<64x128xf32>
    %cst_8 = arith.constant dense<0.000000e+00> : vector<8x128xf32>
    %9 = tpu.matmul %7, %8, %cst_8 {dimension_numbers = #tpu.dot_dimension_numbers<[1], [0], [0], [1], [0, 0, 1, 1], [], []>} : vector<8x64xf32>, vector<64x128xf32>, vector<8x128xf32> -> vector<8x128xf32>
    %c0_9 = arith.constant 0 : index
    %c0_10 = arith.constant 0 : index
    %10 = vector.load %arg4[%c0_9, %c0_10] : memref<1x128xf32, #tpu.memory_space<vmem>>, vector<1x128xf32>
    %11 = vector.broadcast %10 : vector<1x128xf32> to vector<8x128xf32>
    %12 = arith.addf %9, %11 : vector<8x128xf32>
    %cst_11 = arith.constant dense<0xFF800000> : vector<8xf32>
    %13 = vector.multi_reduction <maximumf>, %12, %cst_11 [1] : vector<8x128xf32> to vector<8xf32>
    %14 = vector.shape_cast %13 : vector<8xf32> to vector<8x1xf32>
    %15 = vector.broadcast %14 : vector<8x1xf32> to vector<8x128xf32>
    %16 = arith.subf %12, %15 : vector<8x128xf32>
    %17 = math.exp %16 : vector<8x128xf32>
    %cst_12 = arith.constant dense<0.000000e+00> : vector<8xf32>
    %18 = vector.multi_reduction <add>, %17, %cst_12 [1] : vector<8x128xf32> to vector<8xf32>
    %19 = vector.shape_cast %18 : vector<8xf32> to vector<8x1xf32>
    %20 = math.log %19 : vector<8x1xf32>
    %21 = vector.broadcast %20 : vector<8x1xf32> to vector<8x128xf32>
    %22 = arith.subf %16, %21 : vector<8x128xf32>
    %23 = vector.broadcast %19 : vector<8x1xf32> to vector<8x128xf32>
    %24 = arith.divf %17, %23 : vector<8x128xf32>
    %c0_13 = arith.constant 0 : index
    %c0_14 = arith.constant 0 : index
    %25 = vector.load %arg5[%c0_13, %c0_14] : memref<8x256xf32, #tpu.memory_space<vmem>>, vector<8x128xf32>
    tpu.vector_store %arg5[%c0_13, %c0_14], %22 {strides = array<i32>} : memref<8x256xf32, #tpu.memory_space<vmem>>, vector<8x128xf32>,
    %c0_15 = arith.constant 0 : index
    %c128 = arith.constant 128 : index
    %26 = vector.load %arg5[%c0_15, %c128] : memref<8x256xf32, #tpu.memory_space<vmem>>, vector<8x128xf32>
    tpu.vector_store %arg5[%c0_15, %c128], %24 {strides = array<i32>} : memref<8x256xf32, #tpu.memory_space<vmem>>, vector<8x128xf32>,
    return
  }
}

</mosaic_0001>

<bundles_post_ra>
// kernel: tpu_custom_call.1
= control target key start
LH: loop header
LB: loop body
LE: loop exit
PB: predicated region body
PF: predicated region fallthrough
CT: control target
= control target key end

     0   :  { %10 = vsyncpa [#allocation3], 0  ;;  %s462_s0 = inlined_call_operand.hbm [shape: f32[8,16], index: 0, kind: input, shape index: {}]   ;;  %s463_s1 = inlined_call_operand.hbm [shape: f32[16,64], index: 1, kind: input, shape index: {}]   ;;  %s464_s2 = inlined_call_operand.vmem [shape: f32[1,64], index: 2, kind: input, shape index: {}]   ;;  %s465_s3 = inlined_call_operand.hbm [shape: f32[64,128], index: 3, kind: input, shape index: {}]   ;;  %s466_s4 = inlined_call_operand.vmem [shape: f32[1,128], index: 4, kind: input, shape index: {}]   ;;  %s467_s5 = inlined_call_operand.hbm [shape: f32[8,256], index: 5, kind: output, shape index: {}]  }
   0x1   :  { %11 = vsyncpa [#allocation6], 0 }
   0x2   :  { %12 = vsyncpa [#allocation4], 0  ;;  %s406_s18 = smov [#allocation5]  }
   0x3   :  { %s28_s19 = sshll.u32 %s406_s18, 4  ;;  %s29_s19 = int_to_ptr.vmem [resolvable:$true] %s28_s19 }
   0x4   :  { %s328_s20 = scalar_lea.vmem %s29_s19, 256  ;;  %p333_p1 = scmp.lt.s32.totalorder %s29_s19, %s29_s19 }
   0x5   :  { %p329_p0 = scmp.ne.s32.totalorder %s29_s19, %s328_s20  ;;  %p334_p2 = scmp.lt.s32.totalorder %s328_s20, %s328_s20 }
   0x7   :  { %p335_p3 = por %p334_p2, %p333_p1 }
   0x9   :  { %p336_p4 = pnand %p335_p3, %p329_p0 }
   0xb   :  { %339 = shalt.err (!%p336_p4)
}
   0xc   :  { %s407_s21 = smov 128   ;;  %s408_s22 = smov 8  }
   0xd   :  { %34 = dma.hbm_to_vmem [thread:$0]  %s463_s1, 256, %s29_s19, [#allocation6], %s407_s21, %s407_s21, %s408_s22  }
   0xe   :  { %s409_s25 = smov [#allocation2]   ;;  %s410_s27 = smov [#allocation7]  }
   0xf   :  { %s19_s26 = sshll.u32 %s409_s25, 4  ;;  %s42_s28 = sshll.u32 %s410_s27, 4  ;;  %s20_s26 = int_to_ptr.vmem [resolvable:$true] %s19_s26  ;;  %s43_s28 = int_to_ptr.vmem [resolvable:$true] %s42_s28 }
  0x10   :  { %s348_s29 = scalar_lea.vmem %s20_s26, 128  ;;  %p353_p6 = scmp.lt.s32.totalorder %s20_s26, %s20_s26 }
  0x11   :  { %p349_p5 = scmp.ne.s32.totalorder %s20_s26, %s348_s29  ;;  %p354_p7 = scmp.lt.s32.totalorder %s348_s29, %s348_s29 }
  0x13   :  { %p355_p8 = por %p354_p7, %p353_p6 }
  0x15   :  { %p356_p9 = pnand %p355_p8, %p349_p5 }
  0x17   :  { %359 = shalt.err (!%p356_p9)
}
  0x18   :  { %22 = dma.hbm_to_vmem [thread:$0]  %s462_s0, 128, %s20_s26, [#allocation3]  }
  0x19   :  { %s368_s7 = scalar_lea.vmem %s43_s28, 1024  ;;  %p373_p11 = scmp.lt.s32.totalorder %s43_s28, %s43_s28 }
  0x1a   :  { %p369_p10 = scmp.ne.s32.totalorder %s43_s28, %s368_s7  ;;  %p374_p12 = scmp.lt.s32.totalorder %s368_s7, %s368_s7 }
  0x1c   :  { %p375_p13 = por %p374_p12, %p373_p11 }
  0x1e   :  { %p376_p0 = pnand %p375_p13, %p369_p10 }
  0x20   :  { %379 = shalt.err (!%p376_p0)
}
  0x21   :  { %48 = dma.hbm_to_vmem [thread:$0]  %s465_s3, 1024, %s43_s28, [#allocation6], %s407_s21, %s407_s21, %s408_s22  }
  0x22   :  { %400 = dma.done.wait [#allocation3], 128  }
  0x23   :  { %401 = vsyncadd [#allocation3], 4294967168 }
  0x24   :  { %402 = dma.done.wait [#allocation6], 1280  }
  0x25   :  { %403 = vsyncadd [#allocation6], 4294966016  ;;  %v411_v0 = vmov 0.0   ;;  %vm412_vm0 = vmmov 0   ;;  %v62_v1 = vld [vmem:[#allocation5 + $0x8] sm:$0xff]  ;;  %v61_v2 = vld [vmem:[#allocation5] sm:$0xff] }
  0x26   :  { %280 = vmatprep.subr.mxu0 %v411_v0  ;;  %284 = vmatprep.mubr.msk.f32.mxu0 %vm412_vm0, %v411_v0  ;;  %v60_v3 = vld [vmem:[#allocation2] sm:$0xff]  ;;  %vm70_vm1 = vcmask 130048   ;;  %v152_v4 = vld [vmem:[#allocation7 + $0x38] sm:$0xff]  ;;  %v151_v5 = vld [vmem:[#allocation7 + $0x30] sm:$0xff]  ;;  %vm160_vm2 = vcmask 523264  }
  0x27   :  { %287 = vmatprep.subr.mxu1 %v411_v0  ;;  %303 = vmatprep.mubr.msk.f32.mxu1 %vm412_vm0, %v411_v0  ;;  %v150_v6 = vld [vmem:[#allocation7 + $0x28] sm:$0xff]  ;;  %v149_v7 = vld [vmem:[#allocation7 + $0x20] sm:$0xff]  ;;  %v148_v8 = vld [vmem:[#allocation7 + $0x18] sm:$0xff] }
  0x28   :  { %281 = vmatpush3.msra.mxu0 %v62_v1  ;;  %288 = vmatpush3.msra.mxu1 %v152_v4  ;;  %v147_v9 = vld [vmem:[#allocation7 + $0x10] sm:$0xff]  ;;  %v146_v10 = vld [vmem:[#allocation7 + $0x8] sm:$0xff]  ;;  %v145_v11 = vld [vmem:[#allocation7] sm:$0xff] }
  0x29   :  { %282 = vmatprep.subr.mxu0 %v411_v0  ;;  %289 = vmatprep.subr.mxu1 %v411_v0  ;;  %v264_v12 = vld [vmem:[%s464_s2] ss:$0 sm:$0xff]  ;;  %s413_s2 = smov [#allocation8]  }
  0x2a   :  { %283 = vmatpush3.msra.mxu0 %v61_v2  ;;  %290 = vmatpush3.msra.mxu1 %v151_v5  ;;  %v266_v17 = vld [vmem:[%s466_s4] ss:$0 sm:$0xff]  ;;  %s254_s11 = sshll.u32 %s413_s2, 4  ;;  %s255_s11 = int_to_ptr.vmem [resolvable:$true] %s254_s11 }
  0x2b   :  { %285 = vmatmul.mubr.msk.f32.vlgmr.msra.gmra.mxu0 %vm70_vm1, %v60_v3  ;;  %291 = vmatprep.subr.mxu1 %v411_v0  ;;  %s380_s4 = scalar_lea.vmem %s255_s11, 256  ;;  %p385_p2 = scmp.lt.s32.totalorder %s255_s11, %s255_s11 }
  0x2c   :  { %292 = vmatpush3.msra.mxu1 %v150_v6  ;;  %p381_p1 = scmp.ne.s32.totalorder %s255_s11, %s380_s4  ;;  %p386_p3 = scmp.lt.s32.totalorder %s380_s4, %s380_s4 }
  0x2d   :  { %293 = vmatprep.subr.mxu1 %v411_v0 }
  0x2e   :  { %294 = vmatpush3.msra.mxu1 %v149_v7  ;;  %p387_p4 = por %p386_p3, %p385_p2 }
  0x2f   :  { %295 = vmatprep.subr.mxu1 %v411_v0 }
  0x30   :  { %296 = vmatpush3.msra.mxu1 %v148_v8  ;;  %p388_p5 = pnand %p387_p4, %p381_p1 }
  0x31   :  { %297 = vmatprep.subr.mxu1 %v411_v0 }
  0x32   :  { %298 = vmatpush3.msra.mxu1 %v147_v9 }
  0x33   :  { %299 = vmatprep.subr.mxu1 %v411_v0 }
  0x34   :  { %300 = vmatpush3.msra.mxu1 %v146_v10 }
  0x35   :  { %301 = vmatprep.subr.mxu1 %v411_v0 }
  0x36   :  { %302 = vmatpush3.msra.mxu1 %v145_v11 }
  0xeb   :  { %v140_v13 = vpop.f32.mrf.mxu0 }
  0xec   :  { %v141_v14 = vadd.f32 %v264_v12, %v140_v13 }
  0xed   :  { %v286_v15 = vpop.f32.mrf.mxu0 }
  0xee   :  { %v144_v16 = vmax.f32 %v141_v14, 0.0 }
  0xf0   :  { %304 = vmatmul.mubr.msk.f32.vlgmr.msra.gmra.mxu1 %vm160_vm2, %v144_v16 }
 0x1b0   :  { %v230_v18 = vpop.f32.mrf.mxu1 }
 0x1b1   :  { %v231_v19 = vadd.f32 %v266_v17, %v230_v18 }
 0x1b2   :  { %v305_v20 = vpop.f32.mrf.mxu1 }
 0x1b3   :  { %234 = vmax.xlane.f32.xlu0 %v231_v19 }
 0x23c   :  { %v235_v21 = vpop.xlane.xlu0 %234 }
 0x23d   :  { %v236_v22 = vsub.f32 %v231_v19, %v235_v21 }
 0x23f   :  { %v237_v23 = vmul.f32 1.442695, %v236_v22 }
 0x241   :  { %314 = vpow2.f32 %v237_v23 }
 0x24e   :  { %v315_v24 = vpop.eup %314 }
 0x24f   :  { %239 = vadd.xlane.f32.xlu0 %v315_v24 }
 0x2d8   :  { %v240_v25 = vpop.xlane.xlu0 %239 }
 0x2d9   :  { %316 = vlog2.f32 %v240_v25 }
 0x2da   :  { %318 = vrcp.f32 %v240_v25 }
 0x2e6   :  { %v317_v26 = vpop.eup %316 }
 0x2e7   :  { %v319_v27 = vpop.eup %318  ;;  %v242_v28 = vmul.f32 0.6931472, %v317_v26 }
 0x2e8   :  { %v245_v29 = vmul.f32 %v319_v27, %v315_v24 }
 0x2e9   :  { %v243_v30 = vsub.f32 %v236_v22, %v242_v28 }
 0x2ea   :  { %247 = vst [vmem:[#allocation8 + $0x8] sm:$0xff] %v245_v29 }
 0x2eb   :  { %246 = vst [vmem:[#allocation8] sm:$0xff] %v243_v30 }
 0x2ec   :  { %391 = shalt.err (!%p388_p5)
}
 0x2ed   :  { %257 = dma.vmem_to_hbm [thread:$0]  %s255_s11, 256, %s467_s5, [#allocation4]  }
 0x2ee   :  { %404 = dma.done.wait [#allocation4], 256  }
 0x2ef   :  { %405 = vsyncadd [#allocation4], 4294967040 }
 0x2f0   :  { %261 = vsyncpa [#allocation3], 1 }
 0x2f1   :  { %262 = vsyncpa [#allocation6], 1 }
 0x2f2   :  { %263 = vsyncpa [#allocation4], 1 }

</bundles_post_ra>
